<compile_context>
chip_gen: v5e
topology: v5e:2x2
jax: 0.10.0
libtpu: 0.0.40
codegen_flags: <defaults>
</compile_context>

<pallas_src>
import functools

import jax
import jax.numpy as jnp
from jax.experimental import pallas as pl
from jax.experimental.pallas import tpu as pltpu

_LANE = 128


def _vmem_capacity_bytes():
    try:
        return int(pltpu.get_tpu_info().vmem_capacity_bytes)
    except Exception:
        return 64 << 20  # conservative fallback (v7x per-TensorCore VMEM)


def _vmem_ceiling(cap):
    # Never declare the whole physical VMEM: leave >= 8 MiB headroom for
    # weights, biases, internal scratch and compiler temporaries
    # (-> 56 MiB on v7x, 120 MiB on v5e/v6e).
    return max(32 << 20, cap - (8 << 20))


def _vmem_limit(usage_bytes, cap):
    return int(min(_vmem_ceiling(cap), max(32 << 20, usage_bytes + (4 << 20))))


# ---------------------------------------------------------------------------
# Fused single-pass kernel: pool + excitation + rescale per row tile.
# ---------------------------------------------------------------------------
def _se_fused_kernel(x_ref, w1_ref, b1_ref, w2_ref, b2_ref, o_ref, *, inv_hw):
    # Squeeze: stream the block through a lane reduction. Do NOT keep the
    # upcast slab bound across the matmuls (avoids a slab-sized f32 temp).
    pooled = jnp.sum(x_ref[...].astype(jnp.float32), axis=-1) * inv_hw  # (tb, C)

    # Excitation: tiny batched matmuls in f32.
    h = jnp.dot(pooled, w1_ref[...],
                preferred_element_type=jnp.float32) + b1_ref[...]       # (tb, Cr)
    h = jnp.maximum(h, 0.0)
    s = jnp.dot(h, w2_ref[...],
                preferred_element_type=jnp.float32) + b2_ref[...]       # (tb, C)
    s = jax.nn.sigmoid(s)

    # Scale: re-read x (cheap vld) and broadcast the gate over the lane axis.
    o_ref[...] = (x_ref[...].astype(jnp.float32) * s[:, :, None]).astype(o_ref.dtype)


def _se_fused(x_flat, w1t, b1r, w2t, b2r, tile_b, vmem_cap):
    B, C, HW = x_flat.shape
    Cr = w1t.shape[1]
    itemsize = x_flat.dtype.itemsize
    # double-buffered in + out blocks + one transient f32 block
    usage = tile_b * C * HW * (4 * itemsize + 4)

    return pl.pallas_call(
        functools.partial(_se_fused_kernel, inv_hw=1.0 / HW),
        out_shape=jax.ShapeDtypeStruct((B, C, HW), x_flat.dtype),
        grid_spec=pltpu.PrefetchScalarGridSpec(
            num_scalar_prefetch=0,
            grid=(pl.cdiv(B, tile_b),),
            in_specs=[
                pl.BlockSpec((tile_b, C, HW), lambda i: (i, 0, 0)),  # x
                pl.BlockSpec((C, Cr), lambda i: (0, 0)),             # W1^T
                pl.BlockSpec((1, Cr), lambda i: (0, 0)),             # b1
                pl.BlockSpec((Cr, C), lambda i: (0, 0)),             # W2^T
                pl.BlockSpec((1, C), lambda i: (0, 0)),              # b2
            ],
            out_specs=pl.BlockSpec((tile_b, C, HW), lambda i: (i, 0, 0)),
        ),
        compiler_params=pltpu.CompilerParams(
            dimension_semantics=("parallel",),
            vmem_limit_bytes=_vmem_limit(usage, vmem_cap),
        ),
    )(x_flat, w1t, b1r, w2t, b2r)


# ---------------------------------------------------------------------------
# Two-pass fallback for very large feature maps (per-sample slab > VMEM).
# Pass 1: pool HW in lane chunks (masked partial tail), finalize sigmoid gate.
# Pass 2: rescale x tiled over (batch, HW-chunk); gate is (1, C, 1) so the
#         broadcast over lanes is free (no per-step transpose).
# ---------------------------------------------------------------------------
def _se_pool_gate_kernel(x_ref, w1_ref, b1_ref, w2_ref, b2_ref, gate_ref,
                         acc_ref, *, hw_true, chunk, inv_hw):
    j = pl.program_id(1)

    @pl.when(j == 0)
    def _():
        acc_ref[...] = jnp.zeros_like(acc_ref)

    x = x_ref[...].astype(jnp.float32)                        # (1, C, chunk)
    lane = jax.lax.broadcasted_iota(jnp.int32, x.shape, 2)
    valid = (j * chunk + lane) < hw_true                      # mask partial tail
    acc_ref[...] += jnp.sum(jnp.where(valid, x, 0.0), axis=-1)  # (1, C), f32

    @pl.when(j == pl.num_programs(1) - 1)
    def _():
        pooled = acc_ref[...] * inv_hw                                    # (1, C)
        h = jnp.dot(pooled, w1_ref[...],
                    preferred_element_type=jnp.float32) + b1_ref[...]
        h = jnp.maximum(h, 0.0)
        s = jnp.dot(h, w2_ref[...],
                    preferred_element_type=jnp.float32) + b2_ref[...]
        gate_ref[...] = jax.nn.sigmoid(s)[:, :, None]                     # (1, C, 1)


def _se_scale_kernel(gate_ref, x_ref, o_ref):
    # gate (1, C, 1) broadcasts over the lane axis; OOB tail writes are dropped.
    o_ref[...] = (x_ref[...].astype(jnp.float32) * gate_ref[...]).astype(o_ref.dtype)


def _se_two_pass(x_flat, w1t, b1r, w2t, b2r, vmem_cap, chunk_bytes):
    B, C, HW = x_flat.shape
    Cr = w1t.shape[1]
    itemsize = x_flat.dtype.itemsize

    if HW >= _LANE:
        cap_lanes = max(_LANE, (chunk_bytes // (C * itemsize)) // _LANE * _LANE)
        chunk = max(_LANE, min(cap_lanes, (HW // _LANE) * _LANE))
    else:
        chunk = HW
    n_chunks = pl.cdiv(HW, chunk)
    usage = C * chunk * (4 * itemsize + 4)

    gate = pl.pallas_call(
        functools.partial(_se_pool_gate_kernel,
                          hw_true=HW, chunk=chunk, inv_hw=1.0 / HW),
        out_shape=jax.ShapeDtypeStruct((B, C, 1), jnp.float32),
        grid_spec=pltpu.PrefetchScalarGridSpec(
            num_scalar_prefetch=0,
            grid=(B, n_chunks),
            in_specs=[
                pl.BlockSpec((1, C, chunk), lambda b, j: (b, 0, j)),  # x chunk
                pl.BlockSpec((C, Cr), lambda b, j: (0, 0)),
                pl.BlockSpec((1, Cr), lambda b, j: (0, 0)),
                pl.BlockSpec((Cr, C), lambda b, j: (0, 0)),
                pl.BlockSpec((1, C), lambda b, j: (0, 0)),
            ],
            out_specs=pl.BlockSpec((1, C, 1), lambda b, j: (b, 0, 0)),
            scratch_shapes=[pltpu.VMEM((1, C), jnp.float32)],
        ),
        compiler_params=pltpu.CompilerParams(
            dimension_semantics=("parallel", "arbitrary"),
            vmem_limit_bytes=_vmem_limit(usage, vmem_cap),
        ),
    )(x_flat, w1t, b1r, w2t, b2r)

    out = pl.pallas_call(
        _se_scale_kernel,
        out_shape=jax.ShapeDtypeStruct((B, C, HW), x_flat.dtype),
        grid_spec=pltpu.PrefetchScalarGridSpec(
            num_scalar_prefetch=0,
            grid=(B, n_chunks),
            in_specs=[
                pl.BlockSpec((1, C, 1), lambda b, j: (b, 0, 0)),       # gate
                pl.BlockSpec((1, C, chunk), lambda b, j: (b, 0, j)),   # x chunk
            ],
            out_specs=pl.BlockSpec((1, C, chunk), lambda b, j: (b, 0, j)),
        ),
        compiler_params=pltpu.CompilerParams(
            dimension_semantics=("parallel", "parallel"),
            vmem_limit_bytes=_vmem_limit(usage, vmem_cap),
        ),
    )(gate, x_flat)
    return out


# ---------------------------------------------------------------------------
# Public wrapper
# ---------------------------------------------------------------------------
def se_block(x, w1, b1, w2, b2, *, fused_budget_bytes=None,
             two_pass_chunk_bytes=2 << 20):
    """x: (B, C, H, W) float32 or bfloat16; weights follow torch.nn.Linear:
       w1: (C//r, C), b1: (C//r,), w2: (C, C//r), b2: (C,)."""
    B, C, H, W = x.shape
    Cr = w1.shape[0]
    HW = H * W
    itemsize = x.dtype.itemsize

    vmem_cap = _vmem_capacity_bytes()
    if fused_budget_bytes is None:
        # ~70% of physical VMEM: ~44 MiB on v7x (64 MiB), ~90 MiB on v5e/v6e.
        fused_budget_bytes = min(int(0.70 * vmem_cap), _vmem_ceiling(vmem_cap))

    # Transposed params so the excitation is row-major batched matmuls.
    w1t = w1.T.astype(jnp.float32)               # (C, Cr)
    w2t = w2.T.astype(jnp.float32)               # (Cr, C)
    b1r = b1.reshape(1, Cr).astype(jnp.float32)
    b2r = b2.reshape(1, C).astype(jnp.float32)

    x_flat = x.reshape(B, C, HW)                 # no HBM pad / slice round trips

    # per-sample VMEM: double-buffered in + out blocks + one f32 temp
    per_sample_vmem = C * HW * (4 * itemsize + 4)

    if per_sample_vmem <= fused_budget_bytes:
        # Cap blocks at ~8 MiB and keep several grid steps so the BlockSpec
        # pipeline overlaps in-DMA / compute / out-DMA (op is HBM-bound).
        tile_b = min(B,
                     max(1, fused_budget_bytes // per_sample_vmem),
                     max(1, (8 << 20) // (C * HW * itemsize)))
        if B >= 8:
            tile_b = min(tile_b, B // 8)   # >= 4 steps per TC on v7x megacore
        elif B >= 2:
            tile_b = min(tile_b, B // 2)   # keep both v7x TCs busy
        tile_b = max(1, tile_b)
        out_flat = _se_fused(x_flat, w1t, b1r, w2t, b2r, tile_b, vmem_cap)
    else:
        out_flat = _se_two_pass(x_flat, w1t, b1r, w2t, b2r, vmem_cap,
                                two_pass_chunk_bytes)

    return out_flat.reshape(B, C, H, W)


def se_block_ref(x, w1, b1, w2, b2):
    """Pure-JAX reference matching the PyTorch module semantics."""
    xf = x.astype(jnp.float32)
    y = jnp.mean(xf, axis=(2, 3))                    # (B, C)
    y = jnp.maximum(y @ w1.T + b1, 0.0)
    y = jax.nn.sigmoid(y @ w2.T + b2)
    return (xf * y[:, :, None, None]).astype(x.dtype)


if __name__ == "__main__":
    # Shapes consistent with SEBlock(in_channels=32, reduction=16)
    B, C, reduction = 2, 32, 16
    Cr = C // reduction  # 2

    key = jax.random.PRNGKey(0)
    kx, k1, k2, k3, k4 = jax.random.split(key, 5)

    w1 = jax.random.normal(k1, (Cr, C), dtype=jnp.float32) * 0.1
    b1 = jax.random.normal(k2, (Cr,), dtype=jnp.float32) * 0.1
    w2 = jax.random.normal(k3, (C, Cr), dtype=jnp.float32) * 0.1
    b2 = jax.random.normal(k4, (C,), dtype=jnp.float32) * 0.1

    # 1) fused path, lane-aligned spatial axis (16*16 = 256)
    x = jax.random.normal(kx, (B, C, 16, 16), dtype=jnp.float32)
    out = jax.block_until_ready(se_block(x, w1, b1, w2, b2))
    ref = se_block_ref(x, w1, b1, w2, b2)
    assert out.shape == x.shape
    assert jnp.allclose(out, ref, atol=1e-5, rtol=1e-5), "fused path mismatch"

    # 2) fused path, non-128-multiple spatial axis (14*14 = 196), no padding
    x14 = jax.random.normal(kx, (B, C, 14, 14), dtype=jnp.float32)
    out14 = jax.block_until_ready(se_block(x14, w1, b1, w2, b2))
    ref14 = se_block_ref(x14, w1, b1, w2, b2)
    assert jnp.allclose(out14, ref14, atol=1e-5, rtol=1e-5), "ragged fused mismatch"

    # 3) bf16 input/output (pool / FC / gate math stays in f32)
    x_bf16 = x.astype(jnp.bfloat16)
    out_bf = jax.block_until_ready(se_block(x_bf16, w1, b1, w2, b2))
    ref_bf = se_block_ref(x_bf16, w1, b1, w2, b2)
    assert out_bf.dtype == jnp.bfloat16
    assert jnp.allclose(out_bf.astype(jnp.float32), ref_bf.astype(jnp.float32),
                        atol=2e-2, rtol=2e-2), "bf16 path mismatch"

    # 4) two-pass fallback with a partial last chunk (forced by tiny budgets)
    out_tp = jax.block_until_ready(
        se_block(x14, w1, b1, w2, b2,
                 fused_budget_bytes=1024, two_pass_chunk_bytes=16 * 1024))
    assert jnp.allclose(out_tp, ref14, atol=1e-5, rtol=1e-5), "two-pass mismatch"

    print("KERNEL_OK")
</pallas_src>

<mosaic_0001>
module attributes {stable_mosaic.version = 11 : i64} {
  func.func @_se_fused_kernel(%arg0: i32, %arg1: memref<1x32x256xf32, #tpu.memory_space<vmem>>, %arg2: memref<32x2xf32, #tpu.memory_space<vmem>>, %arg3: memref<1x2xf32, #tpu.memory_space<vmem>>, %arg4: memref<2x32xf32, #tpu.memory_space<vmem>>, %arg5: memref<1x32xf32, #tpu.memory_space<vmem>>, %arg6: memref<1x32x256xf32, #tpu.memory_space<vmem>>) attributes {dimension_semantics = [#tpu.dimension_semantics<parallel>], iteration_bounds = array<i64: 2>, scalar_prefetch = 0 : i64, scratch_operands = 0 : i64, tpu.core_type = #tpu.core_type<tc>, window_params = [{transform_indices = @transform_0, window_bounds = array<i64: 1, 32, 256>}, {pipeline_mode = #tpu.pipeline_mode<synchronous>, transform_indices = @transform_1, window_bounds = array<i64: 32, 2>}, {pipeline_mode = #tpu.pipeline_mode<synchronous>, transform_indices = @transform_2, window_bounds = array<i64: 1, 2>}, {pipeline_mode = #tpu.pipeline_mode<synchronous>, transform_indices = @transform_3, window_bounds = array<i64: 2, 32>}, {pipeline_mode = #tpu.pipeline_mode<synchronous>, transform_indices = @transform_4, window_bounds = array<i64: 1, 32>}, {transform_indices = @transform_5, window_bounds = array<i64: 1, 32, 256>}]} {
    %c0 = arith.constant 0 : index
    %c0_0 = arith.constant 0 : index
    %c0_1 = arith.constant 0 : index
    %0 = vector.load %arg1[%c0, %c0_0, %c0_1] : memref<1x32x256xf32, #tpu.memory_space<vmem>>, vector<1x32x256xf32>
    %cst = arith.constant dense<0.000000e+00> : vector<1x32xf32>
    %1 = vector.multi_reduction <add>, %0, %cst [2] : vector<1x32x256xf32> to vector<1x32xf32>
    %cst_2 = arith.constant 3.906250e-03 : f32
    %2 = vector.broadcast %cst_2 : f32 to vector<1x32xf32>
    %3 = arith.mulf %1, %2 : vector<1x32xf32>
    %c0_3 = arith.constant 0 : index
    %c0_4 = arith.constant 0 : index
    %4 = vector.load %arg2[%c0_3, %c0_4] : memref<32x2xf32, #tpu.memory_space<vmem>>, vector<32x2xf32>
    %cst_5 = arith.constant dense<0.000000e+00> : vector<1x2xf32>
    %5 = tpu.matmul %3, %4, %cst_5 {dimension_numbers = #tpu.dot_dimension_numbers<[1], [0], [0], [1], [0, 0, 1, 1], [], []>} : vector<1x32xf32>, vector<32x2xf32>, vector<1x2xf32> -> vector<1x2xf32>
    %c0_6 = arith.constant 0 : index
    %c0_7 = arith.constant 0 : index
    %6 = vector.load %arg3[%c0_6, %c0_7] : memref<1x2xf32, #tpu.memory_space<vmem>>, vector<1x2xf32>
    %7 = arith.addf %5, %6 : vector<1x2xf32>
    %cst_8 = arith.constant 0.000000e+00 : f32
    %8 = vector.broadcast %cst_8 : f32 to vector<1x2xf32>
    %9 = arith.maximumf %7, %8 : vector<1x2xf32>
    %c0_9 = arith.constant 0 : index
    %c0_10 = arith.constant 0 : index
    %10 = vector.load %arg4[%c0_9, %c0_10] : memref<2x32xf32, #tpu.memory_space<vmem>>, vector<2x32xf32>
    %cst_11 = arith.constant dense<0.000000e+00> : vector<1x32xf32>
    %11 = tpu.matmul %9, %10, %cst_11 {dimension_numbers = #tpu.dot_dimension_numbers<[1], [0], [0], [1], [0, 0, 1, 1], [], []>} : vector<1x2xf32>, vector<2x32xf32>, vector<1x32xf32> -> vector<1x32xf32>
    %c0_12 = arith.constant 0 : index
    %c0_13 = arith.constant 0 : index
    %12 = vector.load %arg5[%c0_12, %c0_13] : memref<1x32xf32, #tpu.memory_space<vmem>>, vector<1x32xf32>
    %13 = arith.addf %11, %12 : vector<1x32xf32>
    %14 = arith.negf %13 : vector<1x32xf32>
    %15 = math.exp %14 : vector<1x32xf32>
    %cst_14 = arith.constant 1.000000e+00 : f32
    %16 = vector.broadcast %cst_14 : f32 to vector<1x32xf32>
    %17 = arith.addf %16, %15 : vector<1x32xf32>
    %18 = arith.divf %16, %17 : vector<1x32xf32>
    %c0_15 = arith.constant 0 : index
    %c0_16 = arith.constant 0 : index
    %c0_17 = arith.constant 0 : index
    %19 = vector.load %arg1[%c0_15, %c0_16, %c0_17] : memref<1x32x256xf32, #tpu.memory_space<vmem>>, vector<1x32x256xf32>
    %20 = vector.shape_cast %18 : vector<1x32xf32> to vector<1x32x1xf32>
    %21 = vector.broadcast %20 : vector<1x32x1xf32> to vector<1x32x256xf32>
    %22 = arith.mulf %19, %21 : vector<1x32x256xf32>
    %c0_18 = arith.constant 0 : index
    %c0_19 = arith.constant 0 : index
    %c0_20 = arith.constant 0 : index
    %23 = vector.load %arg6[%c0_18, %c0_19, %c0_20] : memref<1x32x256xf32, #tpu.memory_space<vmem>>, vector<1x32x256xf32>
    tpu.vector_store %arg6[%c0_18, %c0_19, %c0_20], %22 {strides = array<i32>} : memref<1x32x256xf32, #tpu.memory_space<vmem>>, vector<1x32x256xf32>,
    return
  }
  func.func @transform_0(%arg0: i32) -> (i32, i32, i32) {
    %c0_i32 = arith.constant 0 : i32
    %c0_i32_0 = arith.constant 0 : i32
    %c0_i32_1 = arith.constant 0 : i32
    return %arg0, %c0_i32, %c0_i32_0 : i32, i32, i32
  }
  func.func @transform_1(%arg0: i32) -> (i32, i32) {
    %c0_i32 = arith.constant 0 : i32
    %c0_i32_0 = arith.constant 0 : i32
    %c0_i32_1 = arith.constant 0 : i32
    return %c0_i32, %c0_i32_0 : i32, i32
  }
  func.func @transform_2(%arg0: i32) -> (i32, i32) {
    %c0_i32 = arith.constant 0 : i32
    %c0_i32_0 = arith.constant 0 : i32
    %c0_i32_1 = arith.constant 0 : i32
    return %c0_i32, %c0_i32_0 : i32, i32
  }
  func.func @transform_3(%arg0: i32) -> (i32, i32) {
    %c0_i32 = arith.constant 0 : i32
    %c0_i32_0 = arith.constant 0 : i32
    %c0_i32_1 = arith.constant 0 : i32
    return %c0_i32, %c0_i32_0 : i32, i32
  }
  func.func @transform_4(%arg0: i32) -> (i32, i32) {
    %c0_i32 = arith.constant 0 : i32
    %c0_i32_0 = arith.constant 0 : i32
    %c0_i32_1 = arith.constant 0 : i32
    return %c0_i32, %c0_i32_0 : i32, i32
  }
  func.func @transform_5(%arg0: i32) -> (i32, i32, i32) {
    %c0_i32 = arith.constant 0 : i32
    %c0_i32_0 = arith.constant 0 : i32
    %c0_i32_1 = arith.constant 0 : i32
    return %arg0, %c0_i32, %c0_i32_0 : i32, i32, i32
  }
}

</mosaic_0001>

<bundles_post_ra>
// kernel: tpu_custom_call.1
= control target key start
LH: loop header
LB: loop body
LE: loop exit
PB: predicated region body
PF: predicated region fallthrough
CT: control target
= control target key end

     0   :  { %10 = vsyncpa [#allocation3], 0  ;;  %s891_s0 = inlined_call_operand.hbm [shape: f32[2,32,256], index: 0, kind: input, shape index: {}]   ;;  %s892_s1 = inlined_call_operand.vmem [shape: f32[32,2], index: 1, kind: input, shape index: {}]   ;;  %s893_s2 = inlined_call_operand.vmem [shape: f32[1,2], index: 2, kind: input, shape index: {}]   ;;  %s894_s3 = inlined_call_operand.vmem [shape: f32[2,32], index: 3, kind: input, shape index: {}]   ;;  %s895_s4 = inlined_call_operand.vmem [shape: f32[1,32], index: 4, kind: input, shape index: {}]   ;;  %s896_s5 = inlined_call_operand.hbm [shape: f32[2,32,256], index: 5, kind: output, shape index: {}]  }
   0x1   :  { %12 = vsyncpa [#allocation3 + $0x1], 0 }
   0x2   :  { %13 = vsyncpa [#allocation4], 0 }
   0x3   :  { %15 = vsyncpa [#allocation4 + $0x1], 0  ;;  %s707_s18 = smov 0   ;;  %s709_s19 = smov 0  }
   0x4   :  { %s711_s20 = smov 0   ;;  %s713_s21 = smov 0  }
   0x5 LB: > { %s728_s22 = sadd.s32 4294967295, %s671_s21   ;;  %s496_s23 = sadd.s32 4294967294, %s671_s21   ;;  %s671_s21 = sphi %s713_s21, %s906_s21   ;;  %s667_s20 = sphi %s711_s20, %s905_s20   ;;  %s663_s19 = sphi %s709_s19, %s904_s19   ;;  %s659_s18 = sphi %s707_s18, %s903_s18  }
   0x6   : > { %s732_s24 = sadd.s32 1, %s671_s21   ;;  %s28_s25 = sadd.s32 1, %s667_s20 }
   0x7   : > { %s25_s26 = ssub.s32 %s671_s21, %s732_s24  ;;  %p35_p0 = scmp.ne.s32.totalorder %s667_s20, %s663_s19 }
   0x8   : > { %p26_p1 = scmp.eq.s32.totalorder %s25_s26, 0  ;;  %p36_p2 = scmp.eq.s32.totalorder %s671_s21, 0 }
   0x9   : > { %p41_p3 = scmp.ne.s32.totalorder %s663_s19, %s659_s18  ;;  %p42_p4 = scmp.eq.s32.totalorder %s728_s22, 0 }
   0xa   : > { %s744_s27 = scalar_select %p26_p1, %s667_s20, %s28_s25  }
   0xb   : > { %p746_p5 = por %p36_p2, %p35_p0  ;;  %p750_p6 = por %p42_p4, %p41_p3 }
   0xc   : > { %p149_p7 = scmp.eq.s32.totalorder %s728_s22, 1  ;;  %p155_p8 = scmp.eq.s32.totalorder %s496_s23, 1 }
   0xd   : > { %p528_p10 = scmp.lt.s32.totalorder %s671_s21, 2  ;;  %s187_s7 = sand.u32 1, %s667_s20  }
   0xe   : > { %p757_p11 = por %p149_p7, %p35_p0  ;;  %p761_p12 = por %p155_p8, %p41_p3 }
   0xf   : > { %s514_s8 = sshll.u32 %s671_s21, 6  ;;  %s499_s9 = sshll.u32 %s187_s7, 6 }
  0x10   : > { %s196_s12 = scalar_lea.hbm %s891_s0, %s514_s8  ;;  %s191_s14 = scalar_lea.vmem [#allocation2], %s499_s9 }
  0x11   : > { %s197_s13 = sshll.u32 %s196_s12, 4  ;;  %s199_s15 = sshll.u32 %s191_s14, 4  ;;  %s198_s13 = int_to_ptr.hbm [resolvable:$true] %s197_s13  ;;  %s200_s15 = int_to_ptr.vmem [resolvable:$true] %s199_s15 }
  0x12   : > { %p772_p13 = pnand %p528_p10, %p746_p5  ;;  %p502_p0 = scmp.ge.s32.totalorder %s671_s21, 1 }
  0x13   : > { %p207_p1 = scmp.lt.s32.totalorder %s671_s21, 3  ;;  %s188_s17 = scalar_lea.sflag [#allocation3], %s187_s7 }
  0x14   : > { %s575_s23 = sshra.s32 %s198_s13, 4  ;;  %p579_p3 = pneg %p772_p13  ;;  %s576_s23 = int_to_ptr.hbm [resolvable:$true] %s575_s23 }
  0x15   : > { %s577_s25 = scalar_lea.hbm %s576_s23, 64  ;;  %s582_s28 = scalar_lea.hbm %s891_s0, 128 }
  0x16   : > { %p578_p2 = scmp.ne.s32.totalorder %s576_s23, %s577_s25  ;;  %p583_p5 = scmp.lt.s32.totalorder %s576_s23, %s891_s0 }
  0x17   : > { %p584_p8 = scmp.lt.s32.totalorder %s582_s28, %s577_s25 }
  0x18   : > { %p580_p4 = pnand %p579_p3, %p578_p2 }
  0x19   : > { %p585_p10 = por %p584_p8, %p583_p5 }
  0x1a   : > { %p581_p7 = pneg %p580_p4 }
  0x1c   : > { %p586_p9 = pnand %p585_p10, %p581_p7 }
  0x1e   : > { %589 = shalt.err (!%p586_p9)
}
  0x1f   : > { %s673_s7 = smov 256   ;;  %s674_s11 = smov 16  }
  0x20   : > { %523 = dma.hbm_to_vmem [thread:$0]  (!%p772_p13), %s198_s13, 1024, %s200_s15, %s188_s17, %s673_s7, %s673_s7, %s674_s11  }
  0x21   : > { %p208_p2 = pnand %p502_p0, %p207_p1 }
  0x22   : > { %s793_s12 = sand.u32 (!%p208_p2), 1, %s663_s19  }
  0x23   : > { %211 = sbr.rel (%p208_p2) target bundleno = 587 (0x24b), region = 40  ;;  %s503_s14 = sshll.u32 (!%p208_p2), %s793_s12, 6 }
  0x24   : > { %s214_s23 = scalar_lea.sflag (!%p208_p2), [#allocation3], %s793_s12  ;;  %s217_s25 = scalar_lea.vmem (!%p208_p2), [#allocation2], %s503_s14 }
  0x28   : > { %650 = dma.done.wait (%p750_p6), %s214_s23, 1024  }
  0x29   : > { %652 = vsyncadd (%p750_p6), %s214_s23, 4294966272  ;;  %v803_v0 = vld [vmem:[%s217_s25] sm:$0xff]  ;;  %v805_v1 = vld [vmem:[%s217_s25 + $0x8] sm:$0xff]  ;;  %v278_v16 = vlaneseq  ;;  %vm283_vm0 = vcmask 130112   ;;  %vm287_vm1 = vcmask 195712   ;;  %vm291_vm2 = vcmask 261312  }
  0x2a   : > { %v807_v2 = vld [vmem:[%s217_s25 + $0x20] sm:$0xff]  ;;  %v253_v3 = vadd.f32 %v805_v1, %v803_v0  ;;  %v811_v4 = vld [vmem:[%s217_s25 + $0x28] sm:$0xff]  ;;  %v815_v6 = vld [vmem:[%s217_s25 + $0x10] sm:$0xff]  ;;  %vm293_vm3 = vcmask 261120   ;;  %vm323_vm4 = vcmask 1041408   ;;  %vm319_vm5 = vcmask 15360  }
  0x2b   : > { %v259_v5 = vadd.f32 %v811_v4, %v807_v2  ;;  %v817_v7 = vld [vmem:[%s217_s25 + $0x18] sm:$0xff]  ;;  %v819_v8 = vld [vmem:[%s217_s25 + $0x30] sm:$0xff]  ;;  %v270_v14 = vld [vmem:[%s892_s1 + $0x8] sm:$0xff]  ;;  %v279_v19 = vand.u32 127, %v278_v16  ;;  %v368_v41 = vshrl.u32 %v278_v16, 7  ;;  %s244_s29 = scalar_lea.vmem [#allocation5], %s503_s14 }
  0x2c   : > { %254 = vadd.xlane.f32.xlu0 %v253_v3  ;;  %v821_v9 = vld [vmem:[%s217_s25 + $0x38] sm:$0xff]  ;;  %v256_v10 = vadd.f32 %v817_v7, %v815_v6  ;;  %v271_v13 = vld [vmem:[%s892_s1 + $0x10] sm:$0xff]  ;;  %v269_v15 = vld [vmem:[%s892_s1] sm:$0xff]  ;;  %s515_s13 = sshll.u32 %s728_s22, 6  ;;  %s420_s26 = sshll.u32 %s244_s29, 4  ;;  %s421_s26 = int_to_ptr.vmem [resolvable:$true] %s420_s26 }
  0x2d   : > { %260 = vadd.xlane.f32.xlu1 %v259_v5  ;;  %v262_v11 = vadd.f32 %v821_v9, %v819_v8  ;;  %v272_v12 = vld [vmem:[%s892_s1 + $0x18] sm:$0xff]  ;;  %v281_v21 = vadd.s32 4294967288, %v279_v19  ;;  %v285_v22 = vadd.s32 4294967280, %v279_v19  ;;  %v289_v25 = vadd.s32 4294967272, %v279_v19  ;;  %v317_v36 = vld [vmem:[%s894_s3] sm:$0x3]  ;;  %566 = vset.pattern.permute.xlu2 %v368_v41  ;;  %s419_s17 = scalar_lea.hbm %s896_s5, %s515_s13 }
  0x2e   : > { %308 = vmatpush.msra.mxu0 %v272_v12  ;;  %506 = vmatpush.msk.msra.mxu1 %vm323_vm4, %v317_v36  ;;  %v273_v37 = vld [vmem:[%s893_s2] sm:$0x1]  ;;  %v387_v42 = vadd.s32 24, %v368_v41  ;;  %v381_v43 = vadd.s32 16, %v368_v41  ;;  %v375_v61 = vadd.s32 8, %v368_v41  ;;  %s422_s8 = sshll.u32 %s419_s17, 4  ;;  %s423_s8 = int_to_ptr.hbm [resolvable:$true] %s422_s8 }
  0x2f   : > { %v318_v44 = vld [vmem:[%s895_s4] sm:$0x1]  ;;  %s408_s22 = scalar_lea.sflag [#allocation4], %s793_s12  ;;  %s619_s14 = sshra.s32 %s423_s8, 4  ;;  %s620_s14 = int_to_ptr.hbm [resolvable:$true] %s619_s14 }
  0x30   : > { %309 = vmatpush.msra.mxu0 %v271_v13  ;;  %569 = vset.pattern.permute.xlu1 %v387_v42  ;;  %s621_s28 = scalar_lea.hbm %s620_s14, 64  ;;  %s625_s7 = scalar_lea.hbm %s896_s5, 128 }
  0x31   : > { %568 = vset.pattern.permute.xlu0 %v381_v43  ;;  %p622_p6 = scmp.ne.s32.totalorder %s620_s14, %s621_s28  ;;  %p626_p0 = scmp.lt.s32.totalorder %s620_s14, %s896_s5 }
  0x32   : > { %310 = vmatpush.msra.mxu0 %v270_v14  ;;  %p627_p1 = scmp.lt.s32.totalorder %s625_s7, %s621_s28 }
  0x33   : > { %p623_p9 = pnand %p622_p6, %p757_p11 }
  0x34   : > { %257 = vadd.xlane.f32.xlu0 %v256_v10  ;;  %311 = vmatpush.msra.mxu0 %v269_v15  ;;  %p628_p3 = por %p627_p1, %p626_p0 }
  0x35   : > { %263 = vadd.xlane.f32.xlu1 %v262_v11  ;;  %p624_p13 = pneg %p623_p9 }
  0x37   : > { %p629_p4 = pnand %p628_p3, %p624_p13 }
  0x9f   : > { %v255_v17 = vpop.xlane.xlu0 %254 }
  0xa0   : > { %v261_v18 = vpop.xlane.xlu1 %260  ;;  %v265_v20 = vmul.f32 0.00390625, %v255_v17 }
  0xa1   : > { %v267_v23 = vmul.f32 0.00390625, %v261_v18 }
  0xa2   : > { %v280_v29 = vperm.slane %v265_v20, %v279_v19 }
  0xa3   : > { %v286_v31 = vperm.slane %v267_v23, %v285_v22 }
  0xa7   : > { %v258_v24 = vpop.xlane.xlu0 %257 }
  0xa8   : > { %v266_v26 = vmul.f32 0.00390625, %v258_v24  ;;  %v264_v27 = vpop.xlane.xlu1 %263 }
  0xa9   : > { %v268_v28 = vmul.f32 0.00390625, %v264_v27 }
  0xaa   : > { %v282_v30 = vperm.slane %v266_v26, %v281_v21 }
  0xab   : > { %v290_v32 = vperm.slane %v268_v28, %v289_v25 }
  0xac   : > { %v284_v33 = vsel %vm283_vm0, %v282_v30, %v280_v29 }
  0xad   : > { %v288_v34 = vsel %vm287_vm1, %v286_v31, %v284_v33 }
  0xae   : > { %v292_v35 = vsel %vm291_vm2, %v290_v32, %v288_v34 }
  0xaf   : > { %505 = vmatmul.msk.f32.vlgmr.msra.gmra.mxu0 %vm293_vm3, %v292_v35 }
 0x12c   : > { %v313_v38 = vpop.f32.mrf.mxu0 }
 0x12d   : > { %v314_v39 = vadd.f32 %v313_v38, %v273_v37 }
 0x12f   : > { %v316_v40 = vmax.f32 %v314_v39, 0.0 }
 0x131   : > { %507 = vmatmul.msk.f32.vlgmr.msra.gmra.mxu1 %vm319_vm5, %v316_v40 }
 0x1ae   : > { %v344_v45 = vpop.f32.mrf.mxu1 }
 0x1af   : > { %v345_v46 = vadd.f32 %v344_v45, %v318_v44 }
 0x1b1   : > { %v508_v47 = vmul.f32 -1.442695, %v345_v46 }
 0x1b3   : > { %571 = vpow2.f32 %v508_v47 }
 0x1b9   : > { %v572_v48 = vpop.eup %571 }
 0x1ba   : > { %v350_v49 = vadd.f32 1.0, %v572_v48 }
 0x1bc   : > { %573 = vrcp.f32 %v350_v49  ;;  %v362_v53 = vand.u32 2147483648, %v350_v49  ;;  %v360_v55 = vand.u32 2147483647, %v350_v49  ;;  %vm356_vm7 = vweird.f32 %v350_v49 }
 0x1be   : > { %v363_v57 = vor.u32 1.1754944e-38, %v362_v53  ;;  %vm361_vm9 = vcmp.eq.f32.partialorder %v360_v55, 8.507059e+37 }
 0x1c2   : > { %v574_v50 = vpop.eup %573 }
 0x1c3   : > { %v352_v51 = vmul.f32 %v574_v50, %v350_v49  ;;  %vm357_vm6 = vweird.f32 %v574_v50 }
 0x1c4   : > { %vm358_vm8 = vmor %vm356_vm7, %vm357_vm6 }
 0x1c5   : > { %v353_v52 = vsub.f32 1.0, %v352_v51 }
 0x1c7   : > { %v354_v54 = vmul.f32 %v574_v50, %v353_v52 }
 0x1c9   : > { %v355_v56 = vadd.f32 %v574_v50, %v354_v54 }
 0x1cb   : > { %v359_v58 = vsel %vm358_vm8, %v574_v50, %v355_v56 }
 0x1cc   : > { %v364_v59 = vsel %vm361_vm9, %v363_v57, %v359_v58 }
 0x1cd   : > { %v366_v60 = vperm.slane %v364_v59, 0 }
 0x1cf   : > { %389 = vperm.xlu1 %569, %v366_v60   ;;  %383 = vperm.xlu0 %568, %v366_v60  }
 0x1d0   : > { %371 = vperm.xlu2 %566, %v366_v60  }
 0x1d7   : > { %570 = vset.pattern.permute.xlu0 %v387_v42 }
 0x1d8   : > { %567 = vset.pattern.permute.xlu2 %v375_v61 }
 0x1e0   : > { %377 = vperm.xlu2 %567, %v366_v60  }
 0x22a   : > { %v372_v62 = vpop.permute.xlu2 %371 }
 0x22b   : > { %v391_v63 = vmul.f32 %v372_v62, %v803_v0  ;;  %v392_v3 = vmul.f32 %v372_v62, %v805_v1 }
 0x22d   : > { %399 = vst [vmem:[%s244_s29] sm:$0xff] %v391_v63 }
 0x22e   : > { %400 = vst [vmem:[%s244_s29 + $0x8] sm:$0xff] %v392_v3 }
 0x23a   : > { %v378_v5 = vpop.permute.xlu2 %377 }
 0x23b   : > { %v393_v10 = vmul.f32 %v378_v5, %v815_v6  ;;  %v394_v11 = vmul.f32 %v378_v5, %v817_v7 }
 0x23d   : > { %401 = vst [vmem:[%s244_s29 + $0x10] sm:$0xff] %v393_v10 }
 0x23e   : > { %402 = vst [vmem:[%s244_s29 + $0x18] sm:$0xff] %v394_v11 }
 0x241   : > { %v390_v0 = vpop.permute.xlu1 %389  ;;  %v384_v1 = vpop.permute.xlu0 %383 }
 0x242   : > { %v397_v12 = vmul.f32 %v390_v0, %v819_v8  ;;  %v398_v13 = vmul.f32 %v390_v0, %v821_v9  ;;  %v395_v6 = vmul.f32 %v384_v1, %v807_v2  ;;  %v396_v7 = vmul.f32 %v384_v1, %v811_v4 }
 0x244   : > { %405 = vst [vmem:[%s244_s29 + $0x30] sm:$0xff] %v397_v12 }
 0x245   : > { %406 = vst [vmem:[%s244_s29 + $0x38] sm:$0xff] %v398_v13 }
 0x246   : > { %403 = vst [vmem:[%s244_s29 + $0x20] sm:$0xff] %v395_v6 }
 0x247   : > { %404 = vst [vmem:[%s244_s29 + $0x28] sm:$0xff] %v396_v7 }
 0x248   : > { %632 = shalt.err (!%p629_p4)
}
 0x249   : > { %s675_s12 = smov 256   ;;  %s676_s25 = smov 16  }
 0x24a   : > { %518 = dma.vmem_to_hbm [thread:$0]  (%p757_p11), %s421_s26, 1024, %s423_s8, %s408_s22, %s675_s12, %s675_s12, %s676_s25  }
 0x24b PF: > { %s437_s29 = sand.u32 1, %s659_s18   ;;  %p902_p7 = scmp.ge.s32.totalorder %s671_s21, 2 }
 0x24c   : > { %s438_s13 = scalar_lea.sflag [#allocation4], %s437_s29 }
 0x24d   : > { %p525_p5 = pnand %p902_p7, %p761_p12 }
 0x24f   : > { %p526_p8 = pneg %p525_p5 }
 0x251   : > { %654 = dma.done.wait (%p526_p8), %s438_s13, 1024  }
 0x252   : > { %656 = vsyncadd (%p526_p8), %s438_s13, 4294966272  ;;  %p18_p10 = scmp.ge.s32.totalorder %s732_s24, 4   ;;  %s903_s18 = smov %s663_s19 }
 0x253   : > { %s904_s19 = smov %s667_s20  ;;  %s905_s20 = smov %s744_s27 }
 0x254   : > { %s906_s21 = smov %s732_s24  ;;  %20 = sbr.rel (!%p18_p10) target bundleno = 5 (0x5), region = 85 }
 0x259   :  { %444 = vsyncpa [#allocation3], 1 }
 0x25a   :  { %446 = vsyncpa [#allocation3 + $0x1], 1 }
 0x25b   :  { %447 = vsyncpa [#allocation4], 1 }
 0x25c   :  { %449 = vsyncpa [#allocation4 + $0x1], 1 }

</bundles_post_ra>
